<compile_context>
chip_gen: v7x
topology: tpu7x:2x2x1
jax: 0.10.0
libtpu: 0.0.40
codegen_flags: <defaults>
</compile_context>

<pallas_src>
import functools

import jax
import jax.numpy as jnp
from jax.experimental import pallas as pl
from jax.experimental.pallas import tpu as pltpu

BN_EPS = 1e-5


def _round_up(x, m):
    return (x + m - 1) // m * m


def _vmem_limit_bytes():
    cap = 64 * 1024 * 1024            # v7x per-TC physical VMEM (smallest of v5e/v6e/v7x)
    try:
        cap = int(pltpu.get_tpu_info().vmem_capacity_bytes)
    except Exception:                 # query unavailable (e.g. interpret mode) -> stay conservative
        pass
    # ~75% of physical with a hard cap: ~48 MiB on v7x, 96 MiB on v5e/v6e (128 MiB physical).
    return max(32 * 1024 * 1024, min(cap * 3 // 4, 96 * 1024 * 1024))


def _pick_time_tile(l_out, c_in, c_out, in_itemsize):
    """Pick a lane-aligned time tile: as large as a per-tile VMEM budget allows (<=4096)."""
    l128 = _round_up(l_out, 128)
    # Approx VMEM bytes per output column: double-buffered input + output + f32 accumulator.
    per_col = 2 * c_in * in_itemsize + 2 * c_out * 4 + c_out * 4
    budget = 8 * 1024 * 1024          # per-tile working-set budget, safe on all generations
    cap = max(128, min(4096, (budget // per_col) // 128 * 128))
    if l128 <= cap:
        return l128, 1
    n_tiles = -(-l128 // cap)                          # cdiv
    t_tile = _round_up(-(-l128 // n_tiles), 128)       # balance tiles, minimise padding waste
    return t_tile, n_tiles


def _conv_taps(x_full, w_ref, t_tile):
    """Conv as K shifted matmuls: sum_k W_k @ x[:, k:k+T]  -> (C_out, T) f32 (K static, unrolled)."""
    k = w_ref.shape[0]
    c_out = w_ref.shape[1]
    acc = jnp.zeros((c_out, t_tile), jnp.float32)
    for kk in range(k):
        acc += jnp.dot(w_ref[kk], x_full[:, kk:kk + t_tile],
                       preferred_element_type=jnp.float32)
    return acc


def _stats_kernel(x_ref, halo_ref, w_ref, sum_ref, sq_ref, *, l_out):
    # x_ref: (C_in, T)  halo_ref: (C_in, halo_w)  w_ref: (K, C_out, C_in)
    # sum_ref / sq_ref: (C_out, 1) per-batch resident accumulators (batch axis "parallel").
    j = pl.program_id(1)

    @pl.when(j == 0)
    def _():
        sum_ref[...] = jnp.zeros_like(sum_ref)
        sq_ref[...] = jnp.zeros_like(sq_ref)

    t_tile = x_ref.shape[1]
    x_full = jnp.concatenate([x_ref[...], halo_ref[...]], axis=1)
    y = _conv_taps(x_full, w_ref, t_tile)

    # Zero time positions that are only layout padding (t >= L_out); the true count is
    # applied in the wrapper.
    col = jax.lax.broadcasted_iota(jnp.int32, (1, t_tile), 1) + j * t_tile
    y = jnp.where(col < l_out, y, 0.0)

    sum_ref[...] += jnp.sum(y, axis=1, keepdims=True)
    sq_ref[...] += jnp.sum(y * y, axis=1, keepdims=True)


def _apply_kernel(x_ref, halo_ref, w_ref, scale_ref, shift_ref, o_ref):
    # x_ref: (C_in, T)  halo_ref: (C_in, halo_w)  o_ref: (C_out, T)  scale/shift: (C_out, 1)
    t_tile = o_ref.shape[1]
    x_full = jnp.concatenate([x_ref[...], halo_ref[...]], axis=1)
    y = _conv_taps(x_full, w_ref, t_tile)
    # BN folded into one per-channel FMA per element.
    o_ref[...] = (y * scale_ref[...] + shift_ref[...]).astype(o_ref.dtype)


def rep_conv_branch(x, conv_w, bn_gamma, bn_beta, *, padding, eps=BN_EPS,
                    compute_dtype=jnp.float32, out_dtype=jnp.float32):
    """x: (N, C_in, L); conv_w: (C_out, C_in, K); bn_gamma/bn_beta: (C_out,).

    Returns (N, C_out, L_out) in out_dtype, matching bn(conv(x)) in training mode.
    On v6e/v7x use compute_dtype=jnp.bfloat16 (f32 accumulation is kept) to halve x read
    traffic; out_dtype=jnp.bfloat16 halves the writeback when downstream tolerates it.
    """
    n_batch, c_in, l = x.shape
    c_out, c_in_w, k = conv_w.shape
    assert c_in_w == c_in

    l_out = l + 2 * padding - k + 1
    assert l_out > 0
    in_itemsize = jnp.dtype(compute_dtype).itemsize
    t_tile, n_tiles = _pick_time_tile(l_out, c_in, c_out, in_itemsize)
    l_out_pad = t_tile * n_tiles
    halo_w = max(k - 1, 1)

    # Single pad of x: conv zero-padding on the left, zero layout padding on the right so
    # every tile plus its right halo is in bounds.
    total_len = l_out_pad + halo_w
    x_p = jnp.pad(x.astype(compute_dtype),
                  ((0, 0), (0, 0), (padding, total_len - (l + padding))))

    # Tiny per-tile right-halo columns: (N, n_tiles, C_in, halo_w) — boundary columns only
    # (replaces the old full x_tiles stack, which was an extra HBM round-trip of x).
    x_halo = jnp.stack(
        [x_p[:, :, (j + 1) * t_tile:(j + 1) * t_tile + halo_w] for j in range(n_tiles)],
        axis=1)

    w_r = jnp.transpose(conv_w, (2, 0, 1)).astype(compute_dtype)   # (K, C_out, C_in)

    x_spec = pl.BlockSpec((None, c_in, t_tile), lambda b, j: (b, 0, j))
    halo_spec = pl.BlockSpec((None, None, c_in, halo_w), lambda b, j: (b, j, 0, 0))
    w_spec = pl.BlockSpec((k, c_out, c_in), lambda b, j: (0, 0, 0))
    vmem_limit = _vmem_limit_bytes()

    # ---- Pass 1: per-(batch, channel) sum / sum-of-squares partials (batch-parallel). ----
    part_sum, part_sq = pl.pallas_call(
        functools.partial(_stats_kernel, l_out=l_out),
        out_shape=(jax.ShapeDtypeStruct((n_batch, c_out, 1), jnp.float32),
                   jax.ShapeDtypeStruct((n_batch, c_out, 1), jnp.float32)),
        grid_spec=pltpu.PrefetchScalarGridSpec(
            num_scalar_prefetch=0,
            grid=(n_batch, n_tiles),
            in_specs=[x_spec, halo_spec, w_spec],
            out_specs=(pl.BlockSpec((None, c_out, 1), lambda b, j: (b, 0, 0)),
                       pl.BlockSpec((None, c_out, 1), lambda b, j: (b, 0, 0))),
        ),
        compiler_params=pltpu.CompilerParams(
            dimension_semantics=("parallel", "arbitrary"),
            vmem_limit_bytes=vmem_limit),
    )(x_p, x_halo, w_r)

    # Finalize BN statistics in plain JAX (tiny per-channel vectors).
    count = jnp.float32(n_batch * l_out)
    mean = jnp.sum(part_sum[:, :, 0], axis=0) / count                       # (C_out,)
    var = jnp.maximum(jnp.sum(part_sq[:, :, 0], axis=0) / count - mean * mean, 0.0)
    inv_std = jax.lax.rsqrt(var + eps)
    gamma = bn_gamma.astype(jnp.float32)
    beta = bn_beta.astype(jnp.float32)
    scale = (gamma * inv_std).reshape(c_out, 1)
    shift = (beta - mean * gamma * inv_std).reshape(c_out, 1)

    # ---- Pass 2: recompute conv tile + fused per-channel affine, lane-dense NCL output. ----
    y = pl.pallas_call(
        _apply_kernel,
        out_shape=jax.ShapeDtypeStruct((n_batch, c_out, l_out_pad), out_dtype),
        grid_spec=pltpu.PrefetchScalarGridSpec(
            num_scalar_prefetch=0,
            grid=(n_batch, n_tiles),
            in_specs=[x_spec, halo_spec, w_spec,
                      pl.BlockSpec((c_out, 1), lambda b, j: (0, 0)),
                      pl.BlockSpec((c_out, 1), lambda b, j: (0, 0))],
            out_specs=pl.BlockSpec((None, c_out, t_tile), lambda b, j: (b, 0, j)),
        ),
        compiler_params=pltpu.CompilerParams(
            dimension_semantics=("parallel", "parallel"),
            vmem_limit_bytes=vmem_limit),
    )(x_p, x_halo, w_r, scale, shift)

    return y[:, :, :l_out]


def _reference(x, conv_w, bn_gamma, bn_beta, *, padding):
    # Pure-JAX reference (Conv1d no-bias + BatchNorm1d training-mode stats).
    y = jax.lax.conv_general_dilated(
        x, conv_w, window_strides=(1,), padding=[(padding, padding)],
        dimension_numbers=("NCH", "OIH", "NCH"))
    mean = jnp.mean(y, axis=(0, 2), keepdims=True)
    var = jnp.mean((y - mean) ** 2, axis=(0, 2), keepdims=True)
    return (y - mean) * jax.lax.rsqrt(var + BN_EPS) * bn_gamma[None, :, None] + \
        bn_beta[None, :, None]


if __name__ == "__main__":
    # Small shapes consistent with the module: Conv1d input (N, C_in, L).
    N, C_IN, C_OUT, L, K, PAD = 2, 4, 8, 16, 3, 1

    key = jax.random.PRNGKey(0)
    kx, kw, kg, kb = jax.random.split(key, 4)
    x = jax.random.normal(kx, (N, C_IN, L), dtype=jnp.float32)
    conv_w = jax.random.normal(kw, (C_OUT, C_IN, K), dtype=jnp.float32) * 0.1
    bn_gamma = 1.0 + 0.1 * jax.random.normal(kg, (C_OUT,), dtype=jnp.float32)
    bn_beta = 0.1 * jax.random.normal(kb, (C_OUT,), dtype=jnp.float32)

    ref = _reference(x, conv_w, bn_gamma, bn_beta, padding=PAD)

    # f32 path: matches the PyTorch module numerics tightly.
    out = jax.block_until_ready(
        rep_conv_branch(x, conv_w, bn_gamma, bn_beta, padding=PAD))
    assert out.shape == (N, C_OUT, L)
    assert jnp.allclose(out, ref, atol=5e-4, rtol=5e-4), \
        float(jnp.max(jnp.abs(out - ref)))

    # bf16 operands / f32 accumulation (recommended default on v6e/v7x): looser tolerance.
    out_bf16 = jax.block_until_ready(
        rep_conv_branch(x, conv_w, bn_gamma, bn_beta, padding=PAD,
                        compute_dtype=jnp.bfloat16))
    assert jnp.allclose(out_bf16, ref, atol=5e-2, rtol=5e-2)

    # bf16 writeback (halves the largest HBM stream when the consumer tolerates it).
    out_bf16_w = jax.block_until_ready(
        rep_conv_branch(x, conv_w, bn_gamma, bn_beta, padding=PAD,
                        out_dtype=jnp.bfloat16))
    assert out_bf16_w.dtype == jnp.bfloat16
    assert jnp.allclose(out_bf16_w.astype(jnp.float32), ref, atol=5e-2, rtol=5e-2)

    print("KERNEL_OK")
</pallas_src>

<mosaic_0001>
module attributes {stable_mosaic.version = 11 : i64} {
  func.func @_stats_kernel(%arg0: i32, %arg1: i32, %arg2: memref<1x4x128xf32, #tpu.memory_space<vmem>>, %arg3: memref<1x1x4x2xf32, #tpu.memory_space<vmem>>, %arg4: memref<3x8x4xf32, #tpu.memory_space<vmem>>, %arg5: memref<1x8x1xf32, #tpu.memory_space<vmem>>, %arg6: memref<1x8x1xf32, #tpu.memory_space<vmem>>) attributes {dimension_semantics = [#tpu.dimension_semantics<parallel>, #tpu.dimension_semantics<arbitrary>], iteration_bounds = array<i64: 2, 1>, scalar_prefetch = 0 : i64, scratch_operands = 0 : i64, tpu.core_type = #tpu.core_type<tc>, window_params = [{transform_indices = @transform_0, window_bounds = array<i64: 1, 4, 128>}, {transform_indices = @transform_1, window_bounds = array<i64: 1, 1, 4, 2>}, {pipeline_mode = #tpu.pipeline_mode<synchronous>, transform_indices = @transform_2, window_bounds = array<i64: 3, 8, 4>}, {transform_indices = @transform_3, window_bounds = array<i64: 1, 8, 1>}, {transform_indices = @transform_4, window_bounds = array<i64: 1, 8, 1>}]} {
    %c0_i32 = arith.constant 0 : i32
    %0 = arith.cmpi eq, %arg1, %c0_i32 : i32
    %1 = arith.extui %0 : i1 to i32
    %c0_i32_0 = arith.constant 0 : i32
    %2 = arith.cmpi ne, %1, %c0_i32_0 : i32
    scf.if %2 {
      %cst_32 = arith.constant 0.000000e+00 : f32
      %51 = vector.broadcast %cst_32 : f32 to vector<8x1xf32>
      %c0_33 = arith.constant 0 : index
      %c0_34 = arith.constant 0 : index
      %c0_35 = arith.constant 0 : index
      %52 = vector.load %arg5[%c0_33, %c0_34, %c0_35] : memref<1x8x1xf32, #tpu.memory_space<vmem>>, vector<1x8x1xf32>
      %53 = vector.shape_cast %52 : vector<1x8x1xf32> to vector<8x1xf32>
      %54 = vector.shape_cast %51 : vector<8x1xf32> to vector<1x8x1xf32>
      tpu.vector_store %arg5[%c0_33, %c0_34, %c0_35], %54 {strides = array<i32>} : memref<1x8x1xf32, #tpu.memory_space<vmem>>, vector<1x8x1xf32>,
      %cst_36 = arith.constant 0.000000e+00 : f32
      %55 = vector.broadcast %cst_36 : f32 to vector<8x1xf32>
      %c0_37 = arith.constant 0 : index
      %c0_38 = arith.constant 0 : index
      %c0_39 = arith.constant 0 : index
      %56 = vector.load %arg6[%c0_37, %c0_38, %c0_39] : memref<1x8x1xf32, #tpu.memory_space<vmem>>, vector<1x8x1xf32>
      %57 = vector.shape_cast %56 : vector<1x8x1xf32> to vector<8x1xf32>
      %58 = vector.shape_cast %55 : vector<8x1xf32> to vector<1x8x1xf32>
      tpu.vector_store %arg6[%c0_37, %c0_38, %c0_39], %58 {strides = array<i32>} : memref<1x8x1xf32, #tpu.memory_space<vmem>>, vector<1x8x1xf32>,
    } else {
    }
    %c0 = arith.constant 0 : index
    %c0_1 = arith.constant 0 : index
    %c0_2 = arith.constant 0 : index
    %3 = vector.load %arg2[%c0, %c0_1, %c0_2] : memref<1x4x128xf32, #tpu.memory_space<vmem>>, vector<1x4x128xf32>
    %4 = vector.shape_cast %3 : vector<1x4x128xf32> to vector<4x128xf32>
    %c0_3 = arith.constant 0 : index
    %c0_4 = arith.constant 0 : index
    %c0_5 = arith.constant 0 : index
    %c0_6 = arith.constant 0 : index
    %5 = vector.load %arg3[%c0_3, %c0_4, %c0_5, %c0_6] : memref<1x1x4x2xf32, #tpu.memory_space<vmem>>, vector<1x1x4x2xf32>
    %6 = vector.shape_cast %5 : vector<1x1x4x2xf32> to vector<4x2xf32>
    %7 = tpu.concatenate %4, %6 in 1 : vector<4x128xf32>, vector<4x2xf32> -> vector<4x130xf32>
    %cst = arith.constant 0.000000e+00 : f32
    %8 = vector.broadcast %cst : f32 to vector<8x128xf32>
    %c0_7 = arith.constant 0 : index
    %c0_8 = arith.constant 0 : index
    %c0_9 = arith.constant 0 : index
    %9 = vector.load %arg4[%c0_7, %c0_8, %c0_9] : memref<3x8x4xf32, #tpu.memory_space<vmem>>, vector<1x8x4xf32>
    %10 = vector.shape_cast %9 : vector<1x8x4xf32> to vector<8x4xf32>
    %11 = vector.extract_strided_slice %7 {offsets = [0, 0], sizes = [4, 128], strides = [1, 1]} : vector<4x130xf32> to vector<4x128xf32>
    %cst_10 = arith.constant dense<0.000000e+00> : vector<8x128xf32>
    %12 = tpu.matmul %10, %11, %cst_10 {dimension_numbers = #tpu.dot_dimension_numbers<[1], [0], [0], [1], [0, 0, 1, 1], [], []>} : vector<8x4xf32>, vector<4x128xf32>, vector<8x128xf32> -> vector<8x128xf32>
    %13 = arith.addf %8, %12 : vector<8x128xf32>
    %c1 = arith.constant 1 : index
    %c0_11 = arith.constant 0 : index
    %c0_12 = arith.constant 0 : index
    %14 = vector.load %arg4[%c1, %c0_11, %c0_12] : memref<3x8x4xf32, #tpu.memory_space<vmem>>, vector<1x8x4xf32>
    %15 = vector.shape_cast %14 : vector<1x8x4xf32> to vector<8x4xf32>
    %16 = vector.extract_strided_slice %7 {offsets = [0, 1], sizes = [4, 128], strides = [1, 1]} : vector<4x130xf32> to vector<4x128xf32>
    %cst_13 = arith.constant dense<0.000000e+00> : vector<8x128xf32>
    %17 = tpu.matmul %15, %16, %cst_13 {dimension_numbers = #tpu.dot_dimension_numbers<[1], [0], [0], [1], [0, 0, 1, 1], [], []>} : vector<8x4xf32>, vector<4x128xf32>, vector<8x128xf32> -> vector<8x128xf32>
    %18 = arith.addf %13, %17 : vector<8x128xf32>
    %c2 = arith.constant 2 : index
    %c0_14 = arith.constant 0 : index
    %c0_15 = arith.constant 0 : index
    %19 = vector.load %arg4[%c2, %c0_14, %c0_15] : memref<3x8x4xf32, #tpu.memory_space<vmem>>, vector<1x8x4xf32>
    %20 = vector.shape_cast %19 : vector<1x8x4xf32> to vector<8x4xf32>
    %21 = vector.extract_strided_slice %7 {offsets = [0, 2], sizes = [4, 128], strides = [1, 1]} : vector<4x130xf32> to vector<4x128xf32>
    %cst_16 = arith.constant dense<0.000000e+00> : vector<8x128xf32>
    %22 = tpu.matmul %20, %21, %cst_16 {dimension_numbers = #tpu.dot_dimension_numbers<[1], [0], [0], [1], [0, 0, 1, 1], [], []>} : vector<8x4xf32>, vector<4x128xf32>, vector<8x128xf32> -> vector<8x128xf32>
    %23 = arith.addf %18, %22 : vector<8x128xf32>
    %24 = tpu.iota {dimensions = array<i32: 1>} : vector<1x128xi32>
    %c128_i32 = arith.constant 128 : i32
    %25 = arith.muli %arg1, %c128_i32 : i32
    %26 = vector.broadcast %25 : i32 to vector<1x128xi32>
    %27 = arith.addi %24, %26 : vector<1x128xi32>
    %c16_i32 = arith.constant 16 : i32
    %28 = vector.broadcast %c16_i32 : i32 to vector<1x128xi32>
    %29 = arith.cmpi slt, %27, %28 : vector<1x128xi32>
    %cst_17 = arith.constant 0.000000e+00 : f32
    %30 = vector.shape_cast %29 : vector<1x128xi1> to vector<1x128xi1>
    %31 = vector.broadcast %30 : vector<1x128xi1> to vector<8x128xi1>
    %32 = vector.broadcast %cst_17 : f32 to vector<8x128xf32>
    %33 = arith.select %31, %23, %32 : vector<8x128xi1>, vector<8x128xf32>
    %c0_18 = arith.constant 0 : index
    %c0_19 = arith.constant 0 : index
    %c0_20 = arith.constant 0 : index
    %34 = vector.load %arg5[%c0_18, %c0_19, %c0_20] : memref<1x8x1xf32, #tpu.memory_space<vmem>>, vector<1x8x1xf32>
    %35 = vector.shape_cast %34 : vector<1x8x1xf32> to vector<8x1xf32>
    %cst_21 = arith.constant dense<0.000000e+00> : vector<8xf32>
    %36 = vector.multi_reduction <add>, %33, %cst_21 [1] : vector<8x128xf32> to vector<8xf32>
    %37 = vector.shape_cast %36 : vector<8xf32> to vector<8x1xf32>
    %38 = arith.addf %35, %37 : vector<8x1xf32>
    %c0_22 = arith.constant 0 : index
    %c0_23 = arith.constant 0 : index
    %c0_24 = arith.constant 0 : index
    %39 = vector.load %arg5[%c0_22, %c0_23, %c0_24] : memref<1x8x1xf32, #tpu.memory_space<vmem>>, vector<1x8x1xf32>
    %40 = vector.shape_cast %39 : vector<1x8x1xf32> to vector<8x1xf32>
    %41 = vector.shape_cast %38 : vector<8x1xf32> to vector<1x8x1xf32>
    tpu.vector_store %arg5[%c0_22, %c0_23, %c0_24], %41 {strides = array<i32>} : memref<1x8x1xf32, #tpu.memory_space<vmem>>, vector<1x8x1xf32>,
    %c0_25 = arith.constant 0 : index
    %c0_26 = arith.constant 0 : index
    %c0_27 = arith.constant 0 : index
    %42 = vector.load %arg6[%c0_25, %c0_26, %c0_27] : memref<1x8x1xf32, #tpu.memory_space<vmem>>, vector<1x8x1xf32>
    %43 = vector.shape_cast %42 : vector<1x8x1xf32> to vector<8x1xf32>
    %44 = arith.mulf %33, %33 : vector<8x128xf32>
    %cst_28 = arith.constant dense<0.000000e+00> : vector<8xf32>
    %45 = vector.multi_reduction <add>, %44, %cst_28 [1] : vector<8x128xf32> to vector<8xf32>
    %46 = vector.shape_cast %45 : vector<8xf32> to vector<8x1xf32>
    %47 = arith.addf %43, %46 : vector<8x1xf32>
    %c0_29 = arith.constant 0 : index
    %c0_30 = arith.constant 0 : index
    %c0_31 = arith.constant 0 : index
    %48 = vector.load %arg6[%c0_29, %c0_30, %c0_31] : memref<1x8x1xf32, #tpu.memory_space<vmem>>, vector<1x8x1xf32>
    %49 = vector.shape_cast %48 : vector<1x8x1xf32> to vector<8x1xf32>
    %50 = vector.shape_cast %47 : vector<8x1xf32> to vector<1x8x1xf32>
    tpu.vector_store %arg6[%c0_29, %c0_30, %c0_31], %50 {strides = array<i32>} : memref<1x8x1xf32, #tpu.memory_space<vmem>>, vector<1x8x1xf32>,
    return
  }
  func.func @transform_0(%arg0: i32, %arg1: i32) -> (i32, i32, i32) {
    %c0_i32 = arith.constant 0 : i32
    %c0_i32_0 = arith.constant 0 : i32
    return %arg0, %c0_i32, %arg1 : i32, i32, i32
  }
  func.func @transform_1(%arg0: i32, %arg1: i32) -> (i32, i32, i32, i32) {
    %c0_i32 = arith.constant 0 : i32
    %c0_i32_0 = arith.constant 0 : i32
    %c0_i32_1 = arith.constant 0 : i32
    return %arg0, %arg1, %c0_i32, %c0_i32_0 : i32, i32, i32, i32
  }
  func.func @transform_2(%arg0: i32, %arg1: i32) -> (i32, i32, i32) {
    %c0_i32 = arith.constant 0 : i32
    %c0_i32_0 = arith.constant 0 : i32
    %c0_i32_1 = arith.constant 0 : i32
    %c0_i32_2 = arith.constant 0 : i32
    return %c0_i32, %c0_i32_0, %c0_i32_1 : i32, i32, i32
  }
  func.func @transform_3(%arg0: i32, %arg1: i32) -> (i32, i32, i32) {
    %c0_i32 = arith.constant 0 : i32
    %c0_i32_0 = arith.constant 0 : i32
    %c0_i32_1 = arith.constant 0 : i32
    return %arg0, %c0_i32, %c0_i32_0 : i32, i32, i32
  }
  func.func @transform_4(%arg0: i32, %arg1: i32) -> (i32, i32, i32) {
    %c0_i32 = arith.constant 0 : i32
    %c0_i32_0 = arith.constant 0 : i32
    %c0_i32_1 = arith.constant 0 : i32
    return %arg0, %c0_i32, %c0_i32_0 : i32, i32, i32
  }
}

</mosaic_0001>

<bundles_post_ra>
// kernel: tpu_custom_call.1
= control target key start
LH: loop header
LB: loop body
LE: loop exit
PB: predicated region body
PF: predicated region fallthrough
CT: control target
= control target key end

     0   :  { %s774_s15 = smov 0   ;;  %s776_s16 = smov 0   ;;  %s840_s0 = inlined_call_operand.vmem [shape: f32[2,4,130], index: 0, kind: input, shape index: {}]   ;;  %s841_s1 = inlined_call_operand.vmem [shape: f32[2,1,4,2], index: 1, kind: input, shape index: {}]   ;;  %s842_s2 = inlined_call_operand.vmem [shape: f32[3,8,4], index: 2, kind: input, shape index: {}]   ;;  %s843_s3 = inlined_call_operand.vmem [shape: f32[2,8,1], index: 3, kind: output, shape index: {0}]   ;;  %s844_s4 = inlined_call_operand.vmem [shape: f32[2,8,1], index: 4, kind: output, shape index: {1}]  }
   0x1   :  { %s778_s17 = smov 0  }
   0x2 LB: > { %s27_s18 = sadd.s32 1, %s739_s16  ;;  %p652_p0 = scmp.ge.s32.totalorder %s743_s17, 1  ;;  %s743_s17 = sphi %s778_s17, %s15_s17   ;;  %s739_s16 = sphi %s776_s16, %s846_s16   ;;  %s735_s15 = sphi %s774_s15, %s845_s15  }
   0x3   : > { %p29_p1 = scmp.ge.s32.totalorder %s27_s18, 2  ;;  %p196_p2 = scmp.lt.s32.totalorder %s743_s17, 3 }
   0x5   : > { %s848_s18 = smov (%p29_p1, %s27_s18), 0  ;;  %p197_p3 = pnand %p652_p0, %p196_p2 }
   0x6   : > { %p235_p4 = scmp.lt.s32.totalorder (!%p197_p3), %s735_s15, 1  ;;  %v745_v0 = vmov (!%p197_p3), 0.0   ;;  %vm746_vm0 = vmmov (!%p197_p3), 0   ;;  %vm282_vm1 = vcmask (!%p197_p3), 1043456   ;;  %v267_v2 = vld [vmem:[%s842_s2] sm:$0xff] (!%p197_p3)  ;;  %vm278_vm2 = vcmask (!%p197_p3), 31744  }
   0x7   : > { %200 = sbr.rel (%p197_p3) target bundleno = 501 (0x1f5), region = 32  ;;  %680 = vmatprep.subr.mxu0 (!%p197_p3), %v745_v0  ;;  %682 = vmatprep.mubr.msk.f32.mxu0 (!%p197_p3), %vm746_vm0, %v745_v0  ;;  %s747_s29 = smov (!%p197_p3), 126   ;;  %vm436_vm3 = vcmask (!%p197_p3), 1031168   ;;  %vm276_vm4 = vcmask (!%p197_p3), 1039360   ;;  %v658_v8 = vld [vmem:[%s842_s2 + $0x8] sm:$0xff] (!%p197_p3)  ;;  %v663_v9 = vld [vmem:[%s842_s2 + $0x10] sm:$0xff] (!%p197_p3)  ;;  %v514_v12 = vlaneseq (!%p197_p3) }
   0x8   : > { %675 = vmatprep.subr.mxu1 (!%p197_p3), %v745_v0  ;;  %677 = vmatprep.mubr.msk.f32.mxu1 (!%p197_p3), %vm746_vm0, %v745_v0  ;;  %s748_s30 = smov (!%p197_p3), 127   ;;  %vm262_vm5 = vcmask (!%p197_p3), 7168  }
   0x9   : > { %v515_v13 = vand.u32 (!%p197_p3), 127, %v514_v12 }
   0xb   : > { %vm519_vm6 = vcmp.lt.s32.totalorder (!%p197_p3), %v515_v13, 16 }
   0xe   : > { %s850_s15 = smov (!%p235_p4, %s735_s15), 1 }
   0xf   : > { %s794_s19 = sshll.u32 %s850_s15, 3  ;;  %s655_s20 = sshll.u32 %s850_s15, 2 }
  0x10   : > { %s242_s23 = scalar_lea.vmem %s840_s0, %s794_s19  ;;  %s249_s26 = scalar_lea.vmem %s841_s1, %s655_s20 }
  0x11   : > { %v265_v1 = vld [vmem:[%s242_s23] sm:$0xf]  ;;  %s253_s11 = scalar_lea.vmem %s843_s3, %s794_s19  ;;  %s257_s14 = scalar_lea.vmem %s844_s4, %s794_s19 }
  0x12   : > { %432 = vrot.lane.b32.xlu1 %v265_v1, %s747_s29  ;;  %272 = vrot.lane.b32.xlu0 %v265_v1, %s748_s30  ;;  %v266_v3 = vld [vmem:[%s249_s26] sm:$0xf]  ;;  %263 = vst.msk [vmem:[%s253_s11] sm:$0xff] %vm262_vm5, %v745_v0 }
  0x13   : > { %681 = vmatpush3.msk.msra.mxu0 %vm282_vm1, %v265_v1  ;;  %264 = vst.msk [vmem:[%s257_s14] sm:$0xff] %vm262_vm5, %v745_v0 }
  0x14   : > { %683 = vmatmul.mubr.msk.f32.vlgmr.msra.gmra.mrb[0].mxu0 %vm278_vm2, %v267_v2  ;;  %685 = vmatprep.subr.mxu0 %v745_v0 }
  0x15   : > { %687 = vmatprep.mubr.msk.f32.mxu0 %vm746_vm0, %v745_v0 }
  0x16   : > { %434 = vrot.lane.b32.xlu1 %v266_v3, %s747_s29  ;;  %274 = vrot.lane.b32.xlu0 %v266_v3, %s748_s30 }
  0x19   : > { %v523_v21 = vld [vmem:[%s253_s11] sm:$0xff] }
  0x1a   : > { %v529_v23 = vld [vmem:[%s257_s14] sm:$0xff] }
  0x84   : > { %v433_v4 = vpop.permute.xlu1 %432  ;;  %v273_v5 = vpop.permute.xlu0 %272 }
  0x88   : > { %v435_v6 = vpop.permute.xlu1 %434  ;;  %v275_v7 = vpop.permute.xlu0 %274 }
  0x89   : > { %v437_v10 = vsel %vm436_vm3, %v433_v4, %v435_v6  ;;  %v277_v11 = vsel %vm276_vm4, %v273_v5, %v275_v7 }
  0x8a   : > { %676 = vmatpush3.msk.msra.mxu1 %vm282_vm1, %v277_v11  ;;  %686 = vmatpush3.msk.msra.mxu0 %vm282_vm1, %v437_v10 }
  0x8b   : > { %678 = vmatmul.mubr.msk.f32.vlgmr.msra.gmra.mrb[0].mxu1 %vm278_vm2, %v658_v8  ;;  %688 = vmatmul.mubr.msk.f32.vlgmr.msra.gmra.mrb[0].mxu0 %vm278_vm2, %v663_v9 }
 0x15e   : > { %v351_v14 = vpop.f32.mrb[0].mxu1  ;;  %v509_v15 = vpop.f32.mrb[0].mxu0 }
 0x15f   : > { %v690_v16 = vadd.f32 %v509_v15, %v351_v14  ;;  %v689_v17 = vpop.f32.mrb[1].mxu0  ;;  %v679_v18 = vpop.f32.mrb[1].mxu1 }
 0x161   : > { %v522_v19 = vsel %vm519_vm6, %v690_v16, 0.0 }
 0x162   : > { %524 = vadd.xlane.f32.xlu0 %v522_v19  ;;  %v530_v20 = vmul.f32 %v522_v19, %v522_v19 }
 0x164   : > { %531 = vadd.xlane.f32.xlu1 %v530_v20 }
 0x1ef   : > { %v525_v22 = vpop.xlane.xlu0 %524 }
 0x1f0   : > { %v526_v24 = vadd.f32 %v525_v22, %v523_v21 }
 0x1f1   : > { %v532_v25 = vpop.xlane.xlu1 %531 }
 0x1f2   : > { %528 = vst.msk [vmem:[%s253_s11] sm:$0xff] %vm262_vm5, %v526_v24  ;;  %v533_v26 = vadd.f32 %v532_v25, %v529_v23 }
 0x1f4   : > { %534 = vst.msk [vmem:[%s257_s14] sm:$0xff] %vm262_vm5, %v533_v26 }
 0x1f5 PF: > { %s15_s17 = sadd.s32 1, %s743_s17   ;;  %s845_s15 = smov %s739_s16 }
 0x1f6   : > { %p12_p5 = scmp.ge.s32.totalorder %s15_s17, 4   ;;  %s846_s16 = smov %s848_s18 }
 0x1f8   :  { %14 = sbr.rel (!%p12_p5) target bundleno = 2 (0x2), region = 83 }

</bundles_post_ra>
